<compile_context>
chip_gen: v5e
topology: v5e:2x2
jax: 0.10.0
libtpu: 0.0.40
codegen_flags: <defaults>
</compile_context>

<pallas_src>
import math

import jax
import jax.numpy as jnp
from jax.experimental import pallas as pl
from jax.experimental.pallas import tpu as pltpu


def _eca_kernel(w_ref, x_ref, o_ref, ypad_ref):
    # w_ref   : (k,)              f32 conv weights in SMEM
    # x_ref   : (TB, C, HW)       input block in VMEM
    # o_ref   : (TB, C, HW)       output block in VMEM
    # ypad_ref: (TB, C+2*lead, 1) f32 zero-padded pooled vector (VMEM scratch)
    x = x_ref[...]                                   # native dtype (TB, C, HW)
    tb, C, hw = x.shape
    k = w_ref.shape[0]
    pad = (k - 1) // 2
    lead = (ypad_ref.shape[1] - C) // 2              # sublane-aligned halo size

    # Global average pool over the spatial (lane) axis; accumulate in f32.
    y = jnp.sum(x.astype(jnp.float32), axis=-1, keepdims=True) * (1.0 / hw)  # (TB, C, 1)

    # Zero halos + interior write reproduce Conv1d's zero padding exactly.
    if lead > 0:                                     # static Python branch
        ypad_ref[:, :lead, :] = jnp.zeros((tb, lead, 1), jnp.float32)
        ypad_ref[:, lead + C:, :] = jnp.zeros((tb, lead, 1), jnp.float32)
    ypad_ref[:, lead:lead + C, :] = y

    # k-tap channel conv as shifted adds: scale[c] = sum_j w[j] * y[c + j - pad].
    base = lead - pad
    scale = w_ref[0] * ypad_ref[:, base:base + C, :]
    for j in range(1, k):                            # k is tiny and static
        off = base + j
        scale = scale + w_ref[j] * ypad_ref[:, off:off + C, :]

    # Broadcast the per-channel scale over spatial positions; multiply in the
    # input's native dtype (scale is cast down once -> no full-slab upcast).
    o_ref[...] = x * scale.astype(x.dtype)


def eca_forward(x, conv_weight):
    """x: (B, C, H, W), conv_weight: (1, 1, k) float32 (Conv1d weight, no bias)."""
    B, C, H, W = x.shape
    HW = H * W
    k = int(conv_weight.shape[-1])
    pad = (k - 1) // 2
    lead = 0 if pad == 0 else (-(-pad // 8)) * 8     # round pad up to sublane tile
    w = conv_weight.reshape(k).astype(jnp.float32)

    x_flat = x.reshape(B, C, HW)
    itemsize = jnp.dtype(x.dtype).itemsize
    per_batch_bytes = C * HW * itemsize

    # Batch-fused blocks: target ~2 MiB per block (near HBM-roofline DMA
    # efficiency; in+out double buffers ~8 MiB, under the 16 MiB v5e scoped
    # default and comfortable on v7x), but keep >= 2 grid steps when B >= 2 so
    # both v7x TensorCores get parallel work on the "parallel" batch axis.
    target_bytes = 2 * 1024 * 1024
    tb = max(1, min(B, target_bytes // max(per_batch_bytes, 1)))
    if B >= 2:
        tb = min(tb, max(1, B // 2))
    while B % tb:
        tb -= 1
    grid = (B // tb,)
    # TODO(synk): for very large C*H*W (a single batch row approaching VMEM
    # capacity, esp. v7x's 64 MiB) a two-pass spatially tiled variant is needed.

    flops = 2 * B * C * HW + 2 * B * C * k           # pool adds + broadcast mul + conv
    bytes_accessed = 2 * B * C * HW * itemsize + k * 4

    out_flat = pl.pallas_call(
        _eca_kernel,
        out_shape=jax.ShapeDtypeStruct((B, C, HW), x.dtype),
        grid_spec=pltpu.PrefetchScalarGridSpec(
            num_scalar_prefetch=0,
            grid=grid,
            in_specs=[
                pl.BlockSpec(memory_space=pltpu.MemorySpace.SMEM),  # (k,) weights
                pl.BlockSpec((tb, C, HW), lambda b: (b, 0, 0)),     # x block
            ],
            out_specs=pl.BlockSpec((tb, C, HW), lambda b: (b, 0, 0)),
            scratch_shapes=[pltpu.VMEM((tb, C + 2 * lead, 1), jnp.float32)],
        ),
        compiler_params=pltpu.CompilerParams(
            dimension_semantics=("parallel",),
        ),
        cost_estimate=pl.CostEstimate(
            flops=flops, transcendentals=0, bytes_accessed=bytes_accessed),
    )(w, x_flat)

    return out_flat.reshape(B, C, H, W)


def eca_reference(x, conv_weight):
    """Pure-JAX reference mirroring the PyTorch forward."""
    B, C, H, W = x.shape
    k = conv_weight.shape[-1]
    pad = (k - 1) // 2
    y = jnp.mean(x.astype(jnp.float32), axis=(2, 3))  # (B, C)
    y_pad = jnp.pad(y, ((0, 0), (pad, pad)))           # (B, C + 2*pad)
    w = conv_weight.reshape(k).astype(jnp.float32)
    out = jnp.zeros((B, C), dtype=jnp.float32)
    for j in range(k):
        out = out + w[j] * y_pad[:, j:j + C]
    return x.astype(jnp.float32) * out[:, :, None, None]


def _k_size_for_channels(C):
    # Same k_size computation as ECA_layer.__init__
    b_const, gamma = 1, 2
    k_size = int(abs(math.log(C, 2) + b_const) / gamma)
    return k_size if k_size % 2 else k_size + 1


if __name__ == "__main__":
    key = jax.random.PRNGKey(0)

    # Case 1: batch=2, channels=16, spatial=16x16 (C=16 -> k_size=3).
    B, C, H, W = 2, 16, 16, 16
    k_size = _k_size_for_channels(C)
    kx, kw, key = jax.random.split(key, 3)
    x = jax.random.normal(kx, (B, C, H, W), dtype=jnp.float32)
    conv_weight = jax.random.normal(kw, (1, 1, k_size), dtype=jnp.float32) * 0.5

    out = jax.block_until_ready(eca_forward(x, conv_weight))
    ref = eca_reference(x, conv_weight)
    assert out.shape == (B, C, H, W)
    assert jnp.allclose(out, ref, atol=1e-5, rtol=1e-5)

    # Case 2: batch=4, channels=64, spatial=16x16 -> exercises tb=2 batch fusion.
    B, C, H, W = 4, 64, 16, 16
    k_size = _k_size_for_channels(C)
    kx, kw, key = jax.random.split(key, 3)
    x = jax.random.normal(kx, (B, C, H, W), dtype=jnp.float32)
    conv_weight = jax.random.normal(kw, (1, 1, k_size), dtype=jnp.float32) * 0.5

    out = jax.block_until_ready(eca_forward(x, conv_weight))
    ref = eca_reference(x, conv_weight)
    assert out.shape == (B, C, H, W)
    assert jnp.allclose(out, ref, atol=1e-5, rtol=1e-5)

    print("KERNEL_OK")
</pallas_src>

<mosaic_0001>
module attributes {stable_mosaic.version = 11 : i64} {
  func.func @_eca_kernel(%arg0: i32, %arg1: memref<3xf32, #tpu.memory_space<smem>>, %arg2: memref<1x16x256xf32, #tpu.memory_space<vmem>>, %arg3: memref<1x16x256xf32, #tpu.memory_space<vmem>>, %arg4: memref<1x32x1xf32, #tpu.memory_space<vmem>>) attributes {dimension_semantics = [#tpu.dimension_semantics<parallel>], iteration_bounds = array<i64: 2>, scalar_prefetch = 0 : i64, scratch_operands = 1 : i64, tpu.core_type = #tpu.core_type<tc>, window_params = [{transform_indices = @transform_0, window_bounds = array<i64: 3>}, {transform_indices = @transform_1, window_bounds = array<i64: 1, 16, 256>}, {transform_indices = @transform_2, window_bounds = array<i64: 1, 16, 256>}]} {
    %c0 = arith.constant 0 : index
    %c0_0 = arith.constant 0 : index
    %c0_1 = arith.constant 0 : index
    %0 = vector.load %arg2[%c0, %c0_0, %c0_1] : memref<1x16x256xf32, #tpu.memory_space<vmem>>, vector<1x16x256xf32>
    %cst = arith.constant dense<0.000000e+00> : vector<1x16xf32>
    %1 = vector.multi_reduction <add>, %0, %cst [2] : vector<1x16x256xf32> to vector<1x16xf32>
    %2 = vector.shape_cast %1 : vector<1x16xf32> to vector<1x16x1xf32>
    %cst_2 = arith.constant 3.906250e-03 : f32
    %3 = vector.broadcast %cst_2 : f32 to vector<1x16x1xf32>
    %4 = arith.mulf %2, %3 : vector<1x16x1xf32>
    %cst_3 = arith.constant 0.000000e+00 : f32
    %5 = vector.broadcast %cst_3 : f32 to vector<1x8x1xf32>
    %c0_4 = arith.constant 0 : index
    %c0_5 = arith.constant 0 : index
    %c0_6 = arith.constant 0 : index
    %6 = vector.load %arg4[%c0_4, %c0_5, %c0_6] : memref<1x32x1xf32, #tpu.memory_space<vmem>>, vector<1x8x1xf32>
    tpu.vector_store %arg4[%c0_4, %c0_5, %c0_6], %5 {strides = array<i32>} : memref<1x32x1xf32, #tpu.memory_space<vmem>>, vector<1x8x1xf32>,
    %cst_7 = arith.constant 0.000000e+00 : f32
    %7 = vector.broadcast %cst_7 : f32 to vector<1x8x1xf32>
    %c0_8 = arith.constant 0 : index
    %c24 = arith.constant 24 : index
    %c0_9 = arith.constant 0 : index
    %8 = vector.load %arg4[%c0_8, %c24, %c0_9] : memref<1x32x1xf32, #tpu.memory_space<vmem>>, vector<1x8x1xf32>
    tpu.vector_store %arg4[%c0_8, %c24, %c0_9], %7 {strides = array<i32>} : memref<1x32x1xf32, #tpu.memory_space<vmem>>, vector<1x8x1xf32>,
    %c0_10 = arith.constant 0 : index
    %c8 = arith.constant 8 : index
    %c0_11 = arith.constant 0 : index
    %9 = vector.load %arg4[%c0_10, %c8, %c0_11] : memref<1x32x1xf32, #tpu.memory_space<vmem>>, vector<1x16x1xf32>
    tpu.vector_store %arg4[%c0_10, %c8, %c0_11], %4 {strides = array<i32>} : memref<1x32x1xf32, #tpu.memory_space<vmem>>, vector<1x16x1xf32>,
    %c0_12 = arith.constant 0 : index
    %10 = memref.load %arg1[%c0_12] : memref<3xf32, #tpu.memory_space<smem>>
    %c0_13 = arith.constant 0 : index
    %c7 = arith.constant 7 : index
    %c0_14 = arith.constant 0 : index
    %11 = vector.load %arg4[%c0_13, %c7, %c0_14] : memref<1x32x1xf32, #tpu.memory_space<vmem>>, vector<1x16x1xf32>
    %12 = vector.broadcast %10 : f32 to vector<1x16x1xf32>
    %13 = arith.mulf %12, %11 : vector<1x16x1xf32>
    %c1 = arith.constant 1 : index
    %14 = memref.load %arg1[%c1] : memref<3xf32, #tpu.memory_space<smem>>
    %c0_15 = arith.constant 0 : index
    %c8_16 = arith.constant 8 : index
    %c0_17 = arith.constant 0 : index
    %15 = vector.load %arg4[%c0_15, %c8_16, %c0_17] : memref<1x32x1xf32, #tpu.memory_space<vmem>>, vector<1x16x1xf32>
    %16 = vector.broadcast %14 : f32 to vector<1x16x1xf32>
    %17 = arith.mulf %16, %15 : vector<1x16x1xf32>
    %18 = arith.addf %13, %17 : vector<1x16x1xf32>
    %c2 = arith.constant 2 : index
    %19 = memref.load %arg1[%c2] : memref<3xf32, #tpu.memory_space<smem>>
    %c0_18 = arith.constant 0 : index
    %c9 = arith.constant 9 : index
    %c0_19 = arith.constant 0 : index
    %20 = vector.load %arg4[%c0_18, %c9, %c0_19] : memref<1x32x1xf32, #tpu.memory_space<vmem>>, vector<1x16x1xf32>
    %21 = vector.broadcast %19 : f32 to vector<1x16x1xf32>
    %22 = arith.mulf %21, %20 : vector<1x16x1xf32>
    %23 = arith.addf %18, %22 : vector<1x16x1xf32>
    %24 = vector.broadcast %23 : vector<1x16x1xf32> to vector<1x16x256xf32>
    %25 = arith.mulf %0, %24 : vector<1x16x256xf32>
    %c0_20 = arith.constant 0 : index
    %c0_21 = arith.constant 0 : index
    %c0_22 = arith.constant 0 : index
    %26 = vector.load %arg3[%c0_20, %c0_21, %c0_22] : memref<1x16x256xf32, #tpu.memory_space<vmem>>, vector<1x16x256xf32>
    tpu.vector_store %arg3[%c0_20, %c0_21, %c0_22], %25 {strides = array<i32>} : memref<1x16x256xf32, #tpu.memory_space<vmem>>, vector<1x16x256xf32>,
    return
  }
  func.func @transform_0(%arg0: i32) -> i32 {
    %c0_i32 = arith.constant 0 : i32
    %c0_i32_0 = arith.constant 0 : i32
    return %c0_i32 : i32
  }
  func.func @transform_1(%arg0: i32) -> (i32, i32, i32) {
    %c0_i32 = arith.constant 0 : i32
    %c0_i32_0 = arith.constant 0 : i32
    %c0_i32_1 = arith.constant 0 : i32
    return %arg0, %c0_i32, %c0_i32_0 : i32, i32, i32
  }
  func.func @transform_2(%arg0: i32) -> (i32, i32, i32) {
    %c0_i32 = arith.constant 0 : i32
    %c0_i32_0 = arith.constant 0 : i32
    %c0_i32_1 = arith.constant 0 : i32
    return %arg0, %c0_i32, %c0_i32_0 : i32, i32, i32
  }
}

</mosaic_0001>

<bundles_post_ra>
// kernel: tpu_custom_call.1
= control target key start
LH: loop header
LB: loop body
LE: loop exit
PB: predicated region body
PF: predicated region fallthrough
CT: control target
= control target key end

     0   :  { %7 = vsyncpa [#allocation6], 0  ;;  %s710_s0 = inlined_call_operand.hbm [shape: f32[3], index: 0, kind: input, shape index: {}]   ;;  %s711_s1 = inlined_call_operand.hbm [shape: f32[2,16,256], index: 1, kind: input, shape index: {}]   ;;  %s712_s2 = inlined_call_operand.hbm [shape: f32[2,16,256], index: 2, kind: output, shape index: {}]  }
   0x1   :  { %8 = vsyncpa [#allocation4], 0 }
   0x2   :  { %10 = vsyncpa [#allocation4 + $0x1], 0 }
   0x3   :  { %11 = vsyncpa [#allocation5], 0 }
   0x4   :  { %13 = vsyncpa [#allocation5 + $0x1], 0  ;;  %s560_s9 = smov 0   ;;  %s562_s10 = smov 0  }
   0x5   :  { %s564_s11 = smov 0   ;;  %s566_s12 = smov 0  }
   0x6 LB: > { %s581_s13 = sadd.s32 4294967295, %s536_s12   ;;  %s336_s14 = sadd.s32 4294967294, %s536_s12   ;;  %s536_s12 = sphi %s566_s12, %s723_s12   ;;  %s532_s11 = sphi %s564_s11, %s722_s11   ;;  %s528_s10 = sphi %s562_s10, %s721_s10   ;;  %s524_s9 = sphi %s560_s9, %s720_s9  }
   0x7   : > { %s585_s15 = sadd.s32 1, %s536_s12   ;;  %s47_s16 = sadd.s32 1, %s532_s11 }
   0x8   : > { %s44_s17 = ssub.s32 %s536_s12, %s585_s15  ;;  %p54_p0 = scmp.ne.s32.totalorder %s532_s11, %s528_s10 }
   0x9   : > { %p45_p1 = scmp.eq.s32.totalorder %s44_s17, 0  ;;  %p55_p2 = scmp.eq.s32.totalorder %s536_s12, 0 }
   0xa   : > { %p60_p3 = scmp.ne.s32.totalorder %s528_s10, %s524_s9  ;;  %p61_p4 = scmp.eq.s32.totalorder %s581_s13, 0 }
   0xb   : > { %s597_s18 = scalar_select %p45_p1, %s532_s11, %s47_s16  }
   0xc   : > { %p599_p5 = por %p55_p2, %p54_p0  ;;  %p605_p6 = por %p61_p4, %p60_p3 }
   0xd   : > { %p84_p7 = scmp.eq.s32.totalorder %s581_s13, 1  ;;  %p90_p8 = scmp.eq.s32.totalorder %s336_s14, 1 }
   0xe   : > { %p337_p9 = scmp.ge.s32.totalorder %s536_s12, 1  ;;  %p97_p10 = scmp.lt.s32.totalorder %s536_s12, 3 }
   0xf   : > { %p612_p11 = por %p84_p7, %p54_p0  ;;  %p616_p12 = por %p90_p8, %p60_p3 }
  0x10   : > { %p620_p13 = pnand %p337_p9, %p97_p10  ;;  %s109_s26 = sshll.u32 %s710_s0, 4  ;;  %s110_s26 = int_to_ptr.hbm [resolvable:$true] %s109_s26 }
  0x11   : > { %p377_p2 = scmp.lt.s32.totalorder %s536_s12, 2  ;;  %s120_s27 = sand.u32 1, %s532_s11  }
  0x12   : > { %p364_p1 = pneg %p620_p13  ;;  %s340_s29 = sshll.u32 %s120_s27, 5 }
  0x13   : > { %p636_p3 = pnand %p377_p2, %p599_p5  ;;  %s538_s30 = smov [#allocation3]  }
  0x14   : > { %p365_p7 = pnand %p364_p1, %p61_p4  ;;  %s354_s3 = sshll.u32 %s536_s12, 5 }
  0x15   : > { %s124_s4 = scalar_lea.vmem [#allocation7], %s340_s29  ;;  %s129_s8 = scalar_lea.hbm %s711_s1, %s354_s3 }
  0x16   : > { %367 = dma.hbm_to_smem (!%p365_p7), %s110_s26, 16, %s538_s30, [#allocation6]  }
  0x17   : > { %s132_s5 = sshll.u32 %s124_s4, 4  ;;  %s130_s14 = sshll.u32 %s129_s8, 4  ;;  %s133_s5 = int_to_ptr.vmem [resolvable:$true] %s132_s5  ;;  %s131_s14 = int_to_ptr.hbm [resolvable:$true] %s130_s14 }
  0x18   : > { %s121_s16 = scalar_lea.sflag [#allocation4], %s120_s27  ;;  %s436_s17 = sshra.s32 %s131_s14, 4  ;;  %s437_s17 = int_to_ptr.hbm [resolvable:$true] %s436_s17 }
  0x19   : > { %s438_s19 = scalar_lea.hbm %s437_s17, 32  ;;  %p440_p8 = pneg %p636_p3 }
  0x1a   : > { %p439_p5 = scmp.ne.s32.totalorder %s437_s17, %s438_s19  ;;  %s443_s26 = scalar_lea.hbm %s711_s1, 64 }
  0x1b   : > { %p444_p1 = scmp.lt.s32.totalorder %s437_s17, %s711_s1  ;;  %p445_p2 = scmp.lt.s32.totalorder %s443_s26, %s438_s19 }
  0x1c   : > { %p441_p9 = pnand %p440_p8, %p439_p5 }
  0x1d   : > { %p446_p7 = por %p445_p2, %p444_p1 }
  0x1e   : > { %p442_p10 = pneg %p441_p9 }
  0x20   : > { %p447_p0 = pnand %p446_p7, %p442_p10 }
  0x22   : > { %450 = shalt.err (!%p447_p0)
}
  0x23   : > { %s539_s27 = smov 256   ;;  %s540_s3 = smov 16  }
  0x24   : > { %371 = dma.hbm_to_vmem [thread:$0]  (!%p636_p3), %s131_s14, 512, %s133_s5, %s121_s16, %s539_s27, %s539_s27, %s540_s3  }
  0x25   : > { %144 = sbr.rel (%p620_p13) target bundleno = 320 (0x140), region = 28 }
  0x2a   : > { %511 = dma.done.wait (%p61_p4), [#allocation6], 16  }
  0x2b   : > { %513 = vsyncadd (%p61_p4), [#allocation6], 4294967280  ;;  %s661_s4 = sand.u32 1, %s528_s10  }
  0x2c   : > { %s345_s6 = sshll.u32 %s661_s4, 5  ;;  %s152_s7 = scalar_lea.sflag [#allocation4], %s661_s4 }
  0x2d   : > { %s155_s28 = scalar_lea.vmem [#allocation7], %s345_s6 }
  0x2e   : > { %515 = dma.done.wait (%p605_p6), %s152_s7, 512  }
  0x2f   : > { %517 = vsyncadd (%p605_p6), %s152_s7, 4294966784 }
  0x30   : > { %161 = sfence }
  0x31   : > { %v178_v0 = vld [vmem:[%s155_s28] sm:$0xff]  ;;  %v179_v1 = vld [vmem:[%s155_s28 + $0x8] sm:$0xff]  ;;  %vm190_vm0 = vcmask 7168   ;;  %v541_v3 = vmov 0.0   ;;  %v180_v4 = vld [vmem:[%s155_s28 + $0x10] sm:$0xff]  ;;  %v542_v7 = vmov 0  }
  0x32   : > { %v182_v2 = vadd.f32 %v179_v1, %v178_v0  ;;  %191 = vst.msk [vmem:[#allocation2] sm:$0xff] %vm190_vm0, %v541_v3  ;;  %v181_v5 = vld [vmem:[%s155_s28 + $0x18] sm:$0xff]  ;;  %419 = vset.pattern.permute.xlu1 %v542_v7  ;;  %420 = vset.pattern.permute.xlu0 %v542_v7  ;;  %s195_s20 = sld [smem:[#allocation3]]  ;;  %s355_s8 = sshll.u32 %s581_s13, 5 }
  0x33   : > { %192 = vst.msk [vmem:[#allocation2 + $0x18] sm:$0xff] %vm190_vm0, %v541_v3  ;;  %v185_v6 = vadd.f32 %v181_v5, %v180_v4  ;;  %s347_s23 = sld [smem:[#allocation3 + $0x1]]  ;;  %s177_s14 = scalar_lea.vmem [#allocation8], %s345_s6 }
  0x34   : > { %183 = vadd.xlane.f32.xlu0 %v182_v2  ;;  %s348_s5 = sld [smem:[#allocation3 + $0x2]]  ;;  %s247_s19 = scalar_lea.hbm %s712_s2, %s355_s8 }
  0x35   : > { %s248_s24 = sshll.u32 %s177_s14, 4  ;;  %s250_s25 = sshll.u32 %s247_s19, 4  ;;  %s249_s24 = int_to_ptr.vmem [resolvable:$true] %s248_s24  ;;  %s251_s25 = int_to_ptr.hbm [resolvable:$true] %s250_s25 }
  0x36   : > { %s236_s13 = scalar_lea.sflag [#allocation5], %s661_s4  ;;  %s480_s26 = sshra.s32 %s251_s25, 4  ;;  %s481_s26 = int_to_ptr.hbm [resolvable:$true] %s480_s26 }
  0x37   : > { %s482_s29 = scalar_lea.hbm %s481_s26, 32  ;;  %s486_s3 = scalar_lea.hbm %s712_s2, 64 }
  0x38   : > { %v198_v13 = vstv %s195_s20  ;;  %p483_p4 = scmp.ne.s32.totalorder %s481_s26, %s482_s29  ;;  %p487_p0 = scmp.lt.s32.totalorder %s481_s26, %s712_s2 }
  0x39   : > { %v204_v15 = vstv %s347_s23  ;;  %p488_p3 = scmp.lt.s32.totalorder %s486_s3, %s482_s29 }
  0x3a   : > { %v212_v18 = vstv %s348_s5  ;;  %p484_p6 = pnand %p483_p4, %p612_p11 }
  0x3b   : > { %p489_p5 = por %p488_p3, %p487_p0 }
  0x3c   : > { %186 = vadd.xlane.f32.xlu0 %v185_v6  ;;  %p485_p13 = pneg %p484_p6 }
  0x3e   : > { %p490_p8 = pnand %p489_p5, %p485_p13 }
  0xa7   : > { %v184_v8 = vpop.xlane.xlu0 %183 }
  0xa8   : > { %v188_v9 = vmul.f32 0.00390625, %v184_v8 }
  0xaa   : > { %193 = vst.msk [vmem:[#allocation2 + $0x8] sm:$0xff] %vm190_vm0, %v188_v9 }
  0xaf   : > { %v187_v10 = vpop.xlane.xlu0 %186 }
  0xb0   : > { %v189_v11 = vmul.f32 0.00390625, %v187_v10 }
  0xb1   : > { %v196_v12 = vld [vmem:[#allocation2 + $0x7] sm:$0xff] }
  0xb2   : > { %194 = vst.msk [vmem:[#allocation2 + $0x10] sm:$0xff] %vm190_vm0, %v189_v11  ;;  %v202_v14 = vld [vmem:[#allocation2 + $0x8] sm:$0xff]  ;;  %v199_v16 = vmul.f32 %v198_v13, %v196_v12 }
  0xb3   : > { %v205_v17 = vmul.f32 %v204_v15, %v202_v14 }
  0xb5   : > { %v207_v21 = vadd.f32 %v205_v17, %v199_v16 }
  0xb9   : > { %v210_v19 = vld [vmem:[#allocation2 + $0x9] sm:$0xff]  ;;  %v211_v27 = vld [vmem:[#allocation2 + $0x11] sm:$0xff] }
  0xba   : > { %v197_v20 = vld [vmem:[#allocation2 + $0xf] sm:$0xff]  ;;  %v213_v22 = vmul.f32 %v212_v18, %v210_v19  ;;  %v214_v29 = vmul.f32 %v212_v18, %v211_v27 }
  0xbb   : > { %v203_v23 = vld [vmem:[#allocation2 + $0x10] sm:$0xff]  ;;  %v200_v25 = vmul.f32 %v198_v13, %v197_v20 }
  0xbc   : > { %v215_v24 = vadd.f32 %v213_v22, %v207_v21  ;;  %v206_v26 = vmul.f32 %v204_v15, %v203_v23 }
  0xbe   : > { %219 = vperm.xlu1 %419, %v215_v24   ;;  %v208_v28 = vadd.f32 %v206_v26, %v200_v25 }
  0xc0   : > { %v216_v30 = vadd.f32 %v214_v29, %v208_v28 }
  0xc6   : > { %224 = vperm.xlu1 %419, %v216_v30  }
 0x130   : > { %v220_v31 = vpop.permute.xlu1 %219 }
 0x131   : > { %v227_v32 = vmul.f32 %v220_v31, %v178_v0  ;;  %v228_v33 = vmul.f32 %v220_v31, %v179_v1 }
 0x133   : > { %231 = vst [vmem:[%s177_s14] sm:$0xff] %v227_v32 }
 0x134   : > { %232 = vst [vmem:[%s177_s14 + $0x8] sm:$0xff] %v228_v33 }
 0x138   : > { %v225_v34 = vpop.permute.xlu1 %224 }
 0x139   : > { %v229_v35 = vmul.f32 %v225_v34, %v180_v4  ;;  %v230_v36 = vmul.f32 %v225_v34, %v181_v5 }
 0x13b   : > { %233 = vst [vmem:[%s177_s14 + $0x10] sm:$0xff] %v229_v35 }
 0x13c   : > { %234 = vst [vmem:[%s177_s14 + $0x18] sm:$0xff] %v230_v36 }
 0x13d   : > { %493 = shalt.err (!%p490_p8)
}
 0x13e   : > { %s543_s4 = smov 256   ;;  %s544_s28 = smov 16  }
 0x13f   : > { %362 = dma.vmem_to_hbm [thread:$0]  (%p612_p11), %s249_s24, 512, %s251_s25, %s236_s13, %s543_s4, %s543_s4, %s544_s28  }
 0x140 PF: > { %s265_s20 = sand.u32 1, %s524_s9   ;;  %p719_p9 = scmp.ge.s32.totalorder %s536_s12, 2 }
 0x141   : > { %s266_s23 = scalar_lea.sflag [#allocation5], %s265_s20 }
 0x142   : > { %p373_p10 = pnand %p719_p9, %p616_p12 }
 0x144   : > { %p374_p1 = pneg %p373_p10 }
 0x146   : > { %519 = dma.done.wait (%p374_p1), %s266_s23, 512  }
 0x147   : > { %521 = vsyncadd (%p374_p1), %s266_s23, 4294966784  ;;  %p16_p2 = scmp.ge.s32.totalorder %s585_s15, 4   ;;  %s720_s9 = smov %s528_s10 }
 0x148   : > { %s721_s10 = smov %s532_s11  ;;  %s722_s11 = smov %s597_s18 }
 0x149   : > { %s723_s12 = smov %s585_s15  ;;  %18 = sbr.rel (!%p16_p2) target bundleno = 6 (0x6), region = 78 }
 0x14e   :  { %272 = vsyncpa [#allocation4], 1 }
 0x14f   :  { %274 = vsyncpa [#allocation4 + $0x1], 1 }
 0x150   :  { %275 = vsyncpa [#allocation5], 1 }
 0x151   :  { %277 = vsyncpa [#allocation5 + $0x1], 1 }
 0x152   :  { %278 = vsyncpa [#allocation6], 1 }
 0x153   :  { %280 = vsyncpa [#allocation6 + $0x1], 1 }

</bundles_post_ra>
